<compile_context>
chip_gen: v7x
topology: tpu7x:2x2x1
jax: 0.10.0
libtpu: 0.0.40
codegen_flags: <defaults>
</compile_context>

<pallas_src>
import functools

import jax
import jax.numpy as jnp
from jax import lax
from jax.experimental import pallas as pl
from jax.experimental.pallas import tpu as pltpu


def _round_up(x, m):
    return ((x + m - 1) // m) * m


def _pick_tile(dim, target):
    """Largest MXU-friendly tile <= target that divides dim; fall back to full extent."""
    for t in (target, 512, 256, 128):
        if t <= dim and dim % t == 0:
            return t
    return dim


@functools.lru_cache(maxsize=None)
def _vmem_limit_bytes():
    """Generation-aware scoped-VMEM budget: ~75% of physical, capped.

    v5e/v6e (128 MiB physical) -> 96 MiB; v7x (64 MiB) -> 48 MiB; fallback 48 MiB."""
    try:
        cap = int(getattr(pltpu.get_tpu_info(), "vmem_capacity_bytes", 0))
    except Exception:  # pragma: no cover - off-TPU / older runtimes
        cap = 0
    if cap <= 0:
        return 48 * 1024 * 1024
    return max(32 * 1024 * 1024, min(cap * 3 // 4, 96 * 1024 * 1024))


# ---------------------------------------------------------------------------
# One-time parameter preparation (hoisted out of the forward pass)
# ---------------------------------------------------------------------------
def prepare_params(raw, *, compute_dtype=jnp.float32):
    """Concat K|V projection once and pre-cast weights to the MXU compute dtype."""
    cast_w = lambda w: w.astype(compute_dtype)
    return {
        "wq": cast_w(raw["wq"]), "bq": raw["bq"].astype(jnp.float32),
        "wkv": cast_w(jnp.concatenate([raw["wk"], raw["wv"]], axis=0)),      # (2D, D)
        "bkv": jnp.concatenate([raw["bk"], raw["bv"]], axis=0).astype(jnp.float32),
        "wo": cast_w(raw["wo"]), "bo": raw["bo"].astype(jnp.float32),
        # LayerNorm params stay f32 (LN math is f32 in-kernel)
        "q_gamma": raw["q_gamma"].astype(jnp.float32).reshape(1, -1),
        "q_beta": raw["q_beta"].astype(jnp.float32).reshape(1, -1),
        "k_gamma": raw["k_gamma"].astype(jnp.float32).reshape(1, -1),
        "k_beta": raw["k_beta"].astype(jnp.float32).reshape(1, -1),
    }


# ---------------------------------------------------------------------------
# Tiled linear projection kernel:  o = x @ W^T + b   (PyTorch nn.Linear semantics)
# ---------------------------------------------------------------------------
def _linear_kernel(x_ref, w_ref, b_ref, o_ref, acc_ref, *, compute_dtype):
    @pl.when(pl.program_id(2) == 0)
    def _():
        acc_ref[...] = jnp.zeros_like(acc_ref)

    x = x_ref[...]
    w = w_ref[...]
    if x.dtype != compute_dtype:
        x = x.astype(compute_dtype)
    if w.dtype != compute_dtype:       # weights are pre-cast in prepare_params -> no-op
        w = w.astype(compute_dtype)

    acc_ref[...] += lax.dot_general(
        x, w,
        dimension_numbers=(((1,), (1,)), ((), ())),   # contract last dims: x @ W^T
        preferred_element_type=jnp.float32,
    )

    @pl.when(pl.program_id(2) == pl.num_programs(2) - 1)
    def _():
        o_ref[...] = (acc_ref[...] + b_ref[...]).astype(o_ref.dtype)


def linear(x2d, w, b, *, out_dtype, compute_dtype=jnp.float32,
           tm_target=512, tn_target=512, tk_target=512):
    M, Din = x2d.shape
    Dout = w.shape[0]

    tn = _pick_tile(Dout, tn_target)
    tk = _pick_tile(Din, tk_target)
    # Rows (B*L) can be awkward: pad to a sublane-friendly tile multiple instead of
    # collapsing to a single full-extent block (keeps pipelining / bounded VMEM).
    tm = min(tm_target, _round_up(M, 8))
    Mp = _round_up(M, tm)
    x_p = x2d if Mp == M else jnp.pad(x2d, ((0, Mp - M), (0, 0)))

    kernel = functools.partial(_linear_kernel, compute_dtype=compute_dtype)
    out = pl.pallas_call(
        kernel,
        out_shape=jax.ShapeDtypeStruct((Mp, Dout), out_dtype),
        grid_spec=pltpu.PrefetchScalarGridSpec(
            num_scalar_prefetch=0,
            grid=(Mp // tm, Dout // tn, Din // tk),
            in_specs=[
                pl.BlockSpec((tm, tk), lambda i, j, k: (i, k)),
                pl.BlockSpec((tn, tk), lambda i, j, k: (j, k)),
                pl.BlockSpec((1, tn), lambda i, j, k: (0, j)),
            ],
            out_specs=pl.BlockSpec((tm, tn), lambda i, j, k: (i, j)),
            scratch_shapes=[pltpu.VMEM((tm, tn), jnp.float32)],
        ),
        compiler_params=pltpu.CompilerParams(
            dimension_semantics=("parallel", "parallel", "arbitrary"),
            vmem_limit_bytes=_vmem_limit_bytes()),
    )(x_p, w, b.reshape(1, Dout))
    return out if Mp == M else out[:M]


# ---------------------------------------------------------------------------
# Flash-style attention kernel. Grid = (B, Lq tiles, Lkv tiles); kv axis is the
# innermost "arbitrary" reduction with online softmax (m / l / acc scratch).
# Heads are handled inside the kernel so the output stays a single lane-dense
# (tq, D) slab in merged-head layout (no XLA transpose round-trips).
# ---------------------------------------------------------------------------
def _attn_kernel(q_ref, kv_ref, qg_ref, qb_ref, kg_ref, kb_ref, o_ref, *rest,
                 num_heads, head_dim, embed_dim, scale, eps,
                 compute_dtype, return_weights):
    if return_weights:
        w_ref = rest[0]
        q_scr, m_scr, l_scr, acc_scr, out_scr = rest[1:]
    else:
        w_ref = None
        q_scr, m_scr, l_scr, acc_scr, out_scr = rest

    kv_step = pl.program_id(2)

    def layernorm(x, g, b):
        # one-pass variance: E[x^2] - mu^2 (halves cross-lane reductions)
        mu = jnp.mean(x, axis=-1, keepdims=True)
        var = jnp.maximum(jnp.mean(x * x, axis=-1, keepdims=True) - mu * mu, 0.0)
        return (x - mu) * lax.rsqrt(var + eps) * g + b

    @pl.when(kv_step == 0)
    def _():
        m_scr[...] = jnp.full_like(m_scr, -jnp.inf)
        l_scr[...] = jnp.zeros_like(l_scr)
        acc_scr[...] = jnp.zeros_like(acc_scr)
        # LayerNorm q once per (batch, q-tile); fold 1/sqrt(hd) into the small q tensor.
        q_all = q_ref[0].astype(jnp.float32)                       # (tq, D)
        qg, qb = qg_ref[...], qb_ref[...]
        for h in range(num_heads):                                  # static unroll
            lo = h * head_dim
            q_h = layernorm(q_all[:, lo:lo + head_dim], qg, qb) * scale
            q_scr[h] = q_h.astype(q_scr.dtype)

    kv_all = kv_ref[0].astype(jnp.float32)                          # (tkv, 2D) = [K | V]
    kg, kb = kg_ref[...], kb_ref[...]

    for h in range(num_heads):                                      # static unroll over heads
        lo = h * head_dim
        # NOTE: lane-offset slices cost an XLU shuffle per head; the alternative
        # (head-major DMA layout) costs an extra HBM permute of q/kv -> kept in-kernel.
        k_h = layernorm(kv_all[:, lo:lo + head_dim], kg, kb)
        v_h = kv_all[:, embed_dim + lo:embed_dim + lo + head_dim]

        # scores: contract head_dim of q and k directly (no K transpose)
        s = lax.dot_general(q_scr[h].astype(compute_dtype), k_h.astype(compute_dtype),
                            dimension_numbers=(((1,), (1,)), ((), ())),
                            preferred_element_type=jnp.float32)     # (tq, tkv) f32

        m_prev = m_scr[h]
        m_new = jnp.maximum(m_prev, jnp.max(s, axis=-1, keepdims=True))
        alpha = jnp.exp(m_prev - m_new)
        p = jnp.exp(s - m_new)
        l_scr[h] = alpha * l_scr[h] + jnp.sum(p, axis=-1, keepdims=True)
        acc_scr[h] = alpha * acc_scr[h] + jnp.dot(
            p.astype(compute_dtype), v_h.astype(compute_dtype),
            preferred_element_type=jnp.float32)                     # (tq, hd)
        m_scr[h] = m_new
        # dropout(p=config.attention_dropout, training=False) -> identity at inference

        if return_weights:
            # weights path forces a single kv step (enforced in wrapper) -> exact softmax
            w_ref[0, h] = (p * (1.0 / l_scr[h])).astype(w_ref.dtype)

    @pl.when(kv_step == pl.num_programs(2) - 1)
    def _():
        # normalize per head into the merged-head assembly scratch, then one
        # lane-dense (tq, D) store (bounded per-head live ranges, no concatenate).
        for h in range(num_heads):
            lo = h * head_dim
            if return_weights:
                inv = 1.0 / l_scr[h]                                 # exact (parity w/ torch)
            else:
                inv = pl.reciprocal(l_scr[h], approx=True)           # EUP, perf path
            out_scr[:, lo:lo + head_dim] = acc_scr[h] * inv
        o_ref[0] = out_scr[...].astype(o_ref.dtype)


def _attention(q, kv, prepared, *, num_heads, head_dim, embed_dim, scale, eps,
               compute_dtype, return_attn_weights, tq_target=256, tkv_target=512):
    B, Lq, D = q.shape
    _, Lkv, _ = kv.shape

    tq = _pick_tile(Lq, tq_target)
    # returning full attention weights needs whole rows -> single kv tile;
    # perf path tiles Lkv flash-style so VMEM stays bounded for long sequences.
    tkv = Lkv if return_attn_weights else _pick_tile(Lkv, tkv_target)
    nq, nkv = Lq // tq, Lkv // tkv

    kernel = functools.partial(
        _attn_kernel, num_heads=num_heads, head_dim=head_dim, embed_dim=embed_dim,
        scale=scale, eps=eps, compute_dtype=compute_dtype,
        return_weights=return_attn_weights)

    out_shapes = [jax.ShapeDtypeStruct((B, Lq, D), compute_dtype)]
    out_specs = [pl.BlockSpec((1, tq, D), lambda b, qi, ki: (b, qi, 0))]
    if return_attn_weights:
        out_shapes.append(jax.ShapeDtypeStruct((B, num_heads, Lq, Lkv), jnp.float32))
        out_specs.append(
            pl.BlockSpec((1, num_heads, tq, Lkv), lambda b, qi, ki: (b, 0, qi, 0)))

    scratch = [
        pltpu.VMEM((num_heads, tq, head_dim), compute_dtype),   # LN'd, pre-scaled q
        pltpu.VMEM((num_heads, tq, 1), jnp.float32),            # running max m
        pltpu.VMEM((num_heads, tq, 1), jnp.float32),            # running denom l
        pltpu.VMEM((num_heads, tq, head_dim), jnp.float32),     # unnormalized acc
        pltpu.VMEM((tq, D), jnp.float32),                       # merged-head assembly
    ]

    results = pl.pallas_call(
        kernel,
        out_shape=tuple(out_shapes),
        grid_spec=pltpu.PrefetchScalarGridSpec(
            num_scalar_prefetch=0,
            grid=(B, nq, nkv),
            in_specs=[
                pl.BlockSpec((1, tq, D), lambda b, qi, ki: (b, qi, 0)),
                pl.BlockSpec((1, tkv, 2 * D), lambda b, qi, ki: (b, ki, 0)),
                pl.BlockSpec((1, head_dim), lambda b, qi, ki: (0, 0)),
                pl.BlockSpec((1, head_dim), lambda b, qi, ki: (0, 0)),
                pl.BlockSpec((1, head_dim), lambda b, qi, ki: (0, 0)),
                pl.BlockSpec((1, head_dim), lambda b, qi, ki: (0, 0)),
            ],
            out_specs=tuple(out_specs),
            scratch_shapes=scratch),
        compiler_params=pltpu.CompilerParams(
            dimension_semantics=("parallel", "parallel", "arbitrary"),
            vmem_limit_bytes=_vmem_limit_bytes()),
    )(q, kv, prepared["q_gamma"], prepared["q_beta"],
      prepared["k_gamma"], prepared["k_beta"])

    attn_out = results[0]
    attn_w = results[1] if return_attn_weights else None
    return attn_out, attn_w


# ---------------------------------------------------------------------------
# Full CrossAttention forward
# ---------------------------------------------------------------------------
def cross_attention(hidden_states, cross_states, prepared, *, num_heads, eps,
                    compute_dtype=jnp.float32, return_attn_weights=True):
    B, Lq, D = hidden_states.shape
    _, Lkv, _ = cross_states.shape
    hd = D // num_heads
    scale = hd ** (-0.5)

    # q projection; k/v fused into one projection (cross_states read once from HBM);
    # intermediates emitted in compute_dtype (bf16 on the perf path -> half HBM traffic).
    q = linear(hidden_states.reshape(B * Lq, D), prepared["wq"], prepared["bq"],
               out_dtype=compute_dtype, compute_dtype=compute_dtype).reshape(B, Lq, D)
    kv = linear(cross_states.reshape(B * Lkv, D), prepared["wkv"], prepared["bkv"],
                out_dtype=compute_dtype, compute_dtype=compute_dtype).reshape(B, Lkv, 2 * D)

    attn_out, attn_w = _attention(
        q, kv, prepared, num_heads=num_heads, head_dim=hd, embed_dim=D,
        scale=scale, eps=eps, compute_dtype=compute_dtype,
        return_attn_weights=return_attn_weights)

    # heads already merged in (B, Lq, D) layout -> straight into the output projection
    out = linear(attn_out.reshape(B * Lq, D), prepared["wo"], prepared["bo"],
                 out_dtype=jnp.float32, compute_dtype=compute_dtype).reshape(B, Lq, D)
    return out, attn_w


# ---------------------------------------------------------------------------
# Pure-JAX reference (for correctness check)
# ---------------------------------------------------------------------------
def _reference(hidden_states, cross_states, params, *, num_heads, eps):
    B, Lq, D = hidden_states.shape
    _, Lkv, _ = cross_states.shape
    hd = D // num_heads
    scale = hd ** (-0.5)

    def lin(x, w, b):
        return x @ w.T + b

    def ln(x, g, b):
        mu = jnp.mean(x, axis=-1, keepdims=True)
        var = jnp.mean((x - mu) ** 2, axis=-1, keepdims=True)
        return (x - mu) * lax.rsqrt(var + eps) * g + b

    q = lin(hidden_states, params["wq"], params["bq"]).reshape(B, Lq, num_heads, hd).transpose(0, 2, 1, 3)
    k = lin(cross_states, params["wk"], params["bk"]).reshape(B, Lkv, num_heads, hd).transpose(0, 2, 1, 3)
    v = lin(cross_states, params["wv"], params["bv"]).reshape(B, Lkv, num_heads, hd).transpose(0, 2, 1, 3)
    q = ln(q, params["q_gamma"], params["q_beta"])
    k = ln(k, params["k_gamma"], params["k_beta"])
    s = jnp.einsum("bhqd,bhkd->bhqk", q, k) * scale
    w = jax.nn.softmax(s.astype(jnp.float32), axis=-1)
    o = jnp.einsum("bhqk,bhkd->bhqd", w, v)
    o = o.transpose(0, 2, 1, 3).reshape(B, Lq, D)
    return lin(o, params["wo"], params["bo"]), w


if __name__ == "__main__":
    B, Lq, Lkv = 2, 8, 16
    D, H = 32, 4
    hd = D // H
    eps = 1e-6

    key = jax.random.PRNGKey(0)
    ks = jax.random.split(key, 10)
    init = lambda k, shape: (0.02 * jax.random.normal(k, shape)).astype(jnp.float32)

    raw = {
        "wq": init(ks[0], (D, D)), "bq": init(ks[1], (D,)),
        "wk": init(ks[2], (D, D)), "bk": init(ks[3], (D,)),
        "wv": init(ks[4], (D, D)), "bv": init(ks[5], (D,)),
        "wo": init(ks[6], (D, D)), "bo": init(ks[7], (D,)),
        "q_gamma": jnp.ones((hd,), jnp.float32), "q_beta": jnp.zeros((hd,), jnp.float32),
        "k_gamma": jnp.ones((hd,), jnp.float32), "k_beta": jnp.zeros((hd,), jnp.float32),
    }

    hidden_states = jax.random.normal(ks[8], (B, Lq, D), dtype=jnp.float32)
    cross_states = jax.random.normal(ks[9], (B, Lkv, D), dtype=jnp.float32)

    ref_out, ref_w = _reference(hidden_states, cross_states, raw, num_heads=H, eps=eps)

    # f32 path with attention weights (matches PyTorch numerics, exact softmax divide)
    prep_f32 = prepare_params(raw, compute_dtype=jnp.float32)
    out, attn_w = cross_attention(hidden_states, cross_states, prep_f32,
                                  num_heads=H, eps=eps)
    out = jax.block_until_ready(out)
    attn_w = jax.block_until_ready(attn_w)
    assert out.shape == (B, Lq, D) and attn_w.shape == (B, H, Lq, Lkv)
    assert jnp.allclose(out, ref_out, atol=5e-3, rtol=5e-3)
    assert jnp.allclose(attn_w, ref_w, atol=5e-3, rtol=5e-3)

    # bf16-MXU perf path (v6e/v7x recommendation): bf16 weights + intermediates,
    # flash-tiled kv axis, attention weights not materialized.
    prep_bf16 = prepare_params(raw, compute_dtype=jnp.bfloat16)
    out_bf16, w_none = cross_attention(hidden_states, cross_states, prep_bf16,
                                       num_heads=H, eps=eps,
                                       compute_dtype=jnp.bfloat16,
                                       return_attn_weights=False)
    out_bf16 = jax.block_until_ready(out_bf16)
    assert w_none is None and out_bf16.shape == (B, Lq, D)
    assert jnp.allclose(out_bf16, ref_out, atol=5e-2, rtol=5e-2)

    print("KERNEL_OK")
</pallas_src>

<mosaic_0001>
module attributes {stable_mosaic.version = 11 : i64} {
  func.func @_linear_kernel(%arg0: i32, %arg1: i32, %arg2: i32, %arg3: memref<16x32xf32, #tpu.memory_space<vmem>>, %arg4: memref<32x32xf32, #tpu.memory_space<vmem>>, %arg5: memref<1x32xf32, #tpu.memory_space<vmem>>, %arg6: memref<16x32xf32, #tpu.memory_space<vmem>>, %arg7: memref<16x32xf32, #tpu.memory_space<vmem>>) attributes {dimension_semantics = [#tpu.dimension_semantics<parallel>, #tpu.dimension_semantics<parallel>, #tpu.dimension_semantics<arbitrary>], iteration_bounds = array<i64: 1, 1, 1>, scalar_prefetch = 0 : i64, scratch_operands = 1 : i64, tpu.core_type = #tpu.core_type<tc>, window_params = [{transform_indices = @transform_0, window_bounds = array<i64: 16, 32>}, {transform_indices = @transform_1, window_bounds = array<i64: 32, 32>}, {transform_indices = @transform_2, window_bounds = array<i64: 1, 32>}, {transform_indices = @transform_3, window_bounds = array<i64: 16, 32>}]} {
    %c0_i32 = arith.constant 0 : i32
    %0 = arith.cmpi eq, %arg2, %c0_i32 : i32
    %1 = arith.extui %0 : i1 to i32
    %c0_i32_0 = arith.constant 0 : i32
    %2 = arith.cmpi ne, %1, %c0_i32_0 : i32
    scf.if %2 {
      %cst_10 = arith.constant 0.000000e+00 : f32
      %12 = vector.broadcast %cst_10 : f32 to vector<16x32xf32>
      %c0_11 = arith.constant 0 : index
      %c0_12 = arith.constant 0 : index
      %13 = vector.load %arg7[%c0_11, %c0_12] : memref<16x32xf32, #tpu.memory_space<vmem>>, vector<16x32xf32>
      tpu.vector_store %arg7[%c0_11, %c0_12], %12 {strides = array<i32>} : memref<16x32xf32, #tpu.memory_space<vmem>>, vector<16x32xf32>,
    } else {
    }
    %c0 = arith.constant 0 : index
    %c0_1 = arith.constant 0 : index
    %3 = vector.load %arg3[%c0, %c0_1] : memref<16x32xf32, #tpu.memory_space<vmem>>, vector<16x32xf32>
    %c0_2 = arith.constant 0 : index
    %c0_3 = arith.constant 0 : index
    %4 = vector.load %arg4[%c0_2, %c0_3] : memref<32x32xf32, #tpu.memory_space<vmem>>, vector<32x32xf32>
    %c0_4 = arith.constant 0 : index
    %c0_5 = arith.constant 0 : index
    %5 = vector.load %arg7[%c0_4, %c0_5] : memref<16x32xf32, #tpu.memory_space<vmem>>, vector<16x32xf32>
    %cst = arith.constant dense<0.000000e+00> : vector<16x32xf32>
    %6 = tpu.matmul %3, %4, %cst {dimension_numbers = #tpu.dot_dimension_numbers<[1], [1], [0], [0], [0, 0, 1, 0], [], []>} : vector<16x32xf32>, vector<32x32xf32>, vector<16x32xf32> -> vector<16x32xf32>
    %7 = arith.addf %5, %6 : vector<16x32xf32>
    %c0_6 = arith.constant 0 : index
    %c0_7 = arith.constant 0 : index
    %8 = vector.load %arg7[%c0_6, %c0_7] : memref<16x32xf32, #tpu.memory_space<vmem>>, vector<16x32xf32>
    tpu.vector_store %arg7[%c0_6, %c0_7], %7 {strides = array<i32>} : memref<16x32xf32, #tpu.memory_space<vmem>>, vector<16x32xf32>,
    %c0_i32_8 = arith.constant 0 : i32
    %9 = arith.cmpi eq, %arg2, %c0_i32_8 : i32
    %10 = arith.extui %9 : i1 to i32
    %c0_i32_9 = arith.constant 0 : i32
    %11 = arith.cmpi ne, %10, %c0_i32_9 : i32
    scf.if %11 {
      %c0_10 = arith.constant 0 : index
      %c0_11 = arith.constant 0 : index
      %12 = vector.load %arg7[%c0_10, %c0_11] : memref<16x32xf32, #tpu.memory_space<vmem>>, vector<16x32xf32>
      %c0_12 = arith.constant 0 : index
      %c0_13 = arith.constant 0 : index
      %13 = vector.load %arg5[%c0_12, %c0_13] : memref<1x32xf32, #tpu.memory_space<vmem>>, vector<1x32xf32>
      %14 = vector.broadcast %13 : vector<1x32xf32> to vector<16x32xf32>
      %15 = arith.addf %12, %14 : vector<16x32xf32>
      %c0_14 = arith.constant 0 : index
      %c0_15 = arith.constant 0 : index
      %16 = vector.load %arg6[%c0_14, %c0_15] : memref<16x32xf32, #tpu.memory_space<vmem>>, vector<16x32xf32>
      tpu.vector_store %arg6[%c0_14, %c0_15], %15 {strides = array<i32>} : memref<16x32xf32, #tpu.memory_space<vmem>>, vector<16x32xf32>,
    } else {
    }
    return
  }
  func.func @transform_0(%arg0: i32, %arg1: i32, %arg2: i32) -> (i32, i32) {
    %c0_i32 = arith.constant 0 : i32
    return %arg0, %arg2 : i32, i32
  }
  func.func @transform_1(%arg0: i32, %arg1: i32, %arg2: i32) -> (i32, i32) {
    %c0_i32 = arith.constant 0 : i32
    return %arg1, %arg2 : i32, i32
  }
  func.func @transform_2(%arg0: i32, %arg1: i32, %arg2: i32) -> (i32, i32) {
    %c0_i32 = arith.constant 0 : i32
    %c0_i32_0 = arith.constant 0 : i32
    return %c0_i32, %arg1 : i32, i32
  }
  func.func @transform_3(%arg0: i32, %arg1: i32, %arg2: i32) -> (i32, i32) {
    %c0_i32 = arith.constant 0 : i32
    return %arg0, %arg1 : i32, i32
  }
}

</mosaic_0001>

<bundles_post_ra>
// kernel: tpu_custom_call.1
= control target key start
LH: loop header
LB: loop body
LE: loop exit
PB: predicated region body
PF: predicated region fallthrough
CT: control target
= control target key end

     0   :  { %8 = vsyncpa [#allocation4], 0  ;;  %s388_s0 = inlined_call_operand.hbm [shape: f32[16,32], index: 0, kind: input, shape index: {}]   ;;  %s389_s1 = inlined_call_operand.hbm [shape: f32[32,32], index: 1, kind: input, shape index: {}]   ;;  %s390_s2 = inlined_call_operand.vmem [shape: f32[1,32], index: 2, kind: input, shape index: {}]   ;;  %s391_s3 = inlined_call_operand.hbm [shape: f32[16,32], index: 3, kind: output, shape index: {}]  }
   0x1   :  { %9 = vsyncpa [#allocation7], 0 }
   0x2   :  { %10 = vsyncpa [#allocation5], 0  ;;  %s304_s12 = smov [#allocation3]   ;;  %s232_s16 = scalar_lea.hbm %s388_s0, 256 }
   0x3   :  { %s16_s13 = sshll.u32 %s304_s12, 4  ;;  %p233_p0 = scmp.ne.s32.totalorder %s388_s0, %s232_s16  ;;  %s17_s13 = int_to_ptr.vmem [resolvable:$true] %s16_s13 }
   0x4   :  { %p236_p1 = scmp.lt.u32.totalorder %s232_s16, %s388_s0 }
   0x6   :  { %p238_p2 = pnand %p236_p1, %p233_p0 }
   0x8   :  { %241 = shalt.err (!%p238_p2)
}
   0x9   :  { %s242_s21 = scalar_lea.vmem %s17_s13, 256  ;;  %p247_p4 = scmp.lt.s32.totalorder %s17_s13, %s17_s13 }
   0xa   :  { %p243_p3 = scmp.ne.s32.totalorder %s17_s13, %s242_s21  ;;  %p248_p5 = scmp.lt.s32.totalorder %s242_s21, %s242_s21 }
   0xc   :  { %p249_p6 = por %p248_p5, %p247_p4 }
   0xe   :  { %p250_p7 = pnand %p249_p6, %p243_p3 }
  0x10   :  { %253 = shalt.err (!%p250_p7)
}
  0x11   :  { %s305_s22 = smov 128   ;;  %s306_s23 = smov 8  }
  0x12   :  { %22 = dma.hbm_to_vmem [thread:$0]  %s388_s0, 256, %s17_s13, [#allocation4], %s305_s22, %s305_s22, %s306_s23  }
  0x13   :  { %s307_s26 = smov [#allocation6]   ;;  %s254_s30 = scalar_lea.hbm %s389_s1, 512 }
  0x14   :  { %s28_s27 = sshll.u32 %s307_s26, 4  ;;  %p255_p8 = scmp.ne.s32.totalorder %s389_s1, %s254_s30  ;;  %s29_s27 = int_to_ptr.vmem [resolvable:$true] %s28_s27 }
  0x15   :  { %p258_p9 = scmp.lt.u32.totalorder %s254_s30, %s389_s1 }
  0x17   :  { %p260_p10 = pnand %p258_p9, %p255_p8 }
  0x19   :  { %263 = shalt.err (!%p260_p10)
}
  0x1a   :  { %s264_s8 = scalar_lea.vmem %s29_s27, 512  ;;  %p269_p12 = scmp.lt.s32.totalorder %s29_s27, %s29_s27 }
  0x1b   :  { %p265_p11 = scmp.ne.s32.totalorder %s29_s27, %s264_s8  ;;  %p270_p13 = scmp.lt.s32.totalorder %s264_s8, %s264_s8 }
  0x1d   :  { %p271_p0 = por %p270_p13, %p269_p12 }
  0x1f   :  { %p272_p1 = pnand %p271_p0, %p265_p11 }
  0x21   :  { %275 = shalt.err (!%p272_p1)
}
  0x22   :  { %34 = dma.hbm_to_vmem [thread:$0]  %s389_s1, 512, %s29_s27, [#allocation7], %s305_s22, %s305_s22, %s306_s23  }
  0x23   :  { %298 = dma.done.wait [#allocation4], 256  }
  0x24   :  { %299 = vsyncadd [#allocation4], 4294967040 }
  0x25   :  { %300 = dma.done.wait [#allocation7], 512  }
  0x26   :  { %301 = vsyncadd [#allocation7], 4294966784  ;;  %vm47_vm0 = vcmask 261120   ;;  %v308_v0 = vmov 0.0   ;;  %v52_v1 = vld [vmem:[#allocation6] sm:$0xff]  ;;  %v53_v2 = vld [vmem:[#allocation6 + $0x8] sm:$0xff] }
  0x27   :  { %49 = vst.msk [vmem:[#allocation2 + $0x8] sm:$0xff] %vm47_vm0, %v308_v0  ;;  %48 = vst.msk [vmem:[#allocation2] sm:$0xff] %vm47_vm0, %v308_v0  ;;  %v54_v3 = vld [vmem:[#allocation6 + $0x10] sm:$0xff]  ;;  %v214_v4 = vpack.c.bf16 %v53_v2, %v52_v1  ;;  %v55_v5 = vld [vmem:[#allocation6 + $0x18] sm:$0xff]  ;;  %s309_s11 = smov [#allocation8]  }
  0x28   :  { %vm215_vm1 = vmpackc.low %vm47_vm0, %vm47_vm0  ;;  %v50_v6 = vld [vmem:[#allocation3] sm:$0xff]  ;;  %v220_v7 = vpack.c.bf16 %v55_v5, %v54_v3  ;;  %v51_v8 = vld [vmem:[#allocation3 + $0x8] sm:$0xff]  ;;  %s177_s12 = sshll.u32 %s309_s11, 4  ;;  %s178_s12 = int_to_ptr.vmem [resolvable:$true] %s177_s12 }
  0x29   :  { %211 = vmatprep.mubr.msk.f32.mxu0 %vm47_vm0, %v50_v6  ;;  %216 = vmatprep.subr.msk.bf16.mxu0 %vm215_vm1, %v214_v4  ;;  %v196_v15 = vld [vmem:[%s390_s2] ss:$0 sm:$0xff]  ;;  %s276_s13 = scalar_lea.vmem %s178_s12, 256  ;;  %p281_p3 = scmp.lt.s32.totalorder %s178_s12, %s178_s12 }
  0x2a   :  { %219 = vmatpush3.bf16.xpose.msk.msra.mxu0 %vm215_vm1, %v214_v4  ;;  %p277_p2 = scmp.ne.s32.totalorder %s178_s12, %s276_s13  ;;  %p282_p4 = scmp.lt.s32.totalorder %s276_s13, %s276_s13 }
  0x2b   :  { %222 = vmatprep.subr.msk.bf16.mxu0 %vm215_vm1, %v220_v7 }
  0x2c   :  { %p283_p5 = por %p282_p4, %p281_p3 }
  0x2e   :  { %v57_v9 = vld [vmem:[#allocation2 + $0x8] sm:$0xff]  ;;  %v56_v10 = vld [vmem:[#allocation2] sm:$0xff]  ;;  %p284_p6 = pnand %p283_p5, %p277_p2 }
  0x32   :  { %225 = vmatpush3.bf16.xpose.msk.msra.mxu0 %vm215_vm1, %v220_v7 }
  0x39   :  { %212 = vmatmul.mubr.msk.f32.vlgmr.msra.gmra.mrb[0].mxu0 %vm47_vm0, %v51_v8 }
 0x10c   :  { %v213_v11 = vpop.f32.mrb[0].mxu0 }
 0x10d   :  { %v153_v12 = vadd.f32 %v213_v11, %v57_v9  ;;  %v143_v13 = vpop.f32.mrb[1].mxu0 }
 0x10e   :  { %v152_v14 = vadd.f32 %v143_v13, %v56_v10 }
 0x10f   :  { %155 = vst.msk [vmem:[#allocation2 + $0x8] sm:$0xff] %vm47_vm0, %v153_v12 }
 0x110   :  { %154 = vst.msk [vmem:[#allocation2] sm:$0xff] %vm47_vm0, %v152_v14 }
 0x116   :  { %v160_v16 = vld [vmem:[#allocation2 + $0x8] sm:$0xff] }
 0x117   :  { %v159_v17 = vld [vmem:[#allocation2] sm:$0xff]  ;;  %v169_v18 = vadd.f32 %v196_v15, %v160_v16 }
 0x118   :  { %v168_v19 = vadd.f32 %v196_v15, %v159_v17 }
 0x119   :  { %171 = vst.msk [vmem:[#allocation8 + $0x8] sm:$0xff] %vm47_vm0, %v169_v18 }
 0x11a   :  { %170 = vst.msk [vmem:[#allocation8] sm:$0xff] %vm47_vm0, %v168_v19 }
 0x11b   :  { %287 = shalt.err (!%p284_p6)
}
 0x11c   :  { %s288_s15 = scalar_lea.hbm %s391_s3, 256 }
 0x11d   :  { %p289_p7 = scmp.ne.s32.totalorder %s391_s3, %s288_s15  ;;  %p292_p8 = scmp.lt.u32.totalorder %s288_s15, %s391_s3 }
 0x11f   :  { %p294_p9 = pnand %p292_p8, %p289_p7 }
 0x121   :  { %297 = shalt.err (!%p294_p9)
}
 0x122   :  { %183 = dma.vmem_to_hbm [thread:$0]  %s178_s12, 256, %s391_s3, [#allocation5], %s305_s22, %s305_s22, %s306_s23  }
 0x123   :  { %302 = dma.done.wait [#allocation5], 256  }
 0x124   :  { %303 = vsyncadd [#allocation5], 4294967040 }
 0x125   :  { %187 = vsyncpa [#allocation4], 1 }
 0x126   :  { %188 = vsyncpa [#allocation7], 1 }
 0x127   :  { %189 = vsyncpa [#allocation5], 1 }

</bundles_post_ra>
